<compile_context>
chip_gen: v6e
topology: v6e:2x2x1
jax: 0.10.0
libtpu: 0.0.40
codegen_flags: <defaults>
</compile_context>

<pallas_src>
import jax
import jax.numpy as jnp
from jax.experimental import pallas as pl
from jax.experimental.pallas import tpu as pltpu


def subnet_kernel(x_ref, w_ref, b_ref, o_ref, acc_ref):
    # x_ref  : (n_tile, c_tile, H*W)  feature chunk (stored dtype, not upcast)
    # w_ref  : (c_pad, NCP)           resident classifier weight^T * 1/(H*W), f32
    # b_ref  : (1, NCP)               classifier bias (padded), f32
    # o_ref  : (n_tile, NCP)          logits (padded classes)
    # acc_ref: (n_tile, NCP)          f32 accumulator scratch
    c_step = pl.program_id(1)
    c_tile = x_ref.shape[1]

    @pl.when(c_step == 0)
    def _():
        acc_ref[...] = jnp.zeros_like(acc_ref)

    # Spatial sum over the lane-dense last axis, accumulated in f32.
    pooled = jnp.sum(x_ref[...], axis=-1, dtype=jnp.float32)        # (n_tile, c_tile)

    # Slice the resident W^T for this C chunk (aligned, multiple-of hint).
    c0 = pl.multiple_of(c_step * c_tile, c_tile)
    w_chunk = w_ref[pl.ds(c0, c_tile), :]                           # (c_tile, NCP)

    # Partial classifier contribution for this C chunk (MXU, f32 accumulation).
    acc_ref[...] += jnp.dot(pooled, w_chunk,
                            preferred_element_type=jnp.float32)     # (n_tile, NCP)

    @pl.when(c_step == pl.num_programs(1) - 1)
    def _():
        o_ref[...] = (acc_ref[...] + b_ref[...]).astype(o_ref.dtype)


def _round_up(x, m):
    return ((x + m - 1) // m) * m


def _largest_divisor_multiple(dim, target, mult):
    """Largest d <= max(target, mult) with d % mult == 0 and dim % d == 0.

    Falls back to the full dim when mult does not divide dim (or dim <= mult).
    Never returns a value above max(target, mult) otherwise (search is downward).
    """
    if dim % mult != 0 or dim <= mult:
        return dim
    t = max(mult, min(target, dim))
    t -= t % mult
    t = max(t, mult)
    for cand in range(t, mult - 1, -mult):
        if dim % cand == 0:
            return cand
    return mult  # mult divides dim (checked above)


def _vmem_capacity_bytes():
    # Generation-aware: 64 MiB/TC on v7x, 128 MiB on v5e/v6e.
    # Conservative (v7x) fallback if the query is unavailable.
    try:
        cap = int(pltpu.get_tpu_info().vmem_capacity_bytes)
        if cap > 0:
            return cap
    except Exception:
        pass
    return 64 * 1024 * 1024


def subnet_forward(x, weight, bias, *, out_dtype=None):
    """x: (N, C, H, W); weight: (num_classes, C); bias: (num_classes,).

    Returns (N, num_classes) logits in `out_dtype` (default: x.dtype).
    Accumulation is always f32; pass out_dtype=jnp.float32 to match the f32
    PyTorch reference exactly for low-precision inputs.
    """
    n, c, h, w = x.shape
    hw = h * w
    num_classes = weight.shape[0]
    ncp = _round_up(num_classes, 128)                 # lane-dense padded class count
    out_dtype = x.dtype if out_dtype is None else out_dtype

    itemsize = jnp.dtype(x.dtype).itemsize
    out_itemsize = jnp.dtype(out_dtype).itemsize
    # dtype-aware sublane multiple: f32 -> 8, bf16 -> 16, int8/fp8 -> 32.
    sublane = max(8, 32 // itemsize)

    # --- channel padding (only when C is ragged w.r.t. the sublane multiple) ---
    c_pad = _round_up(c, sublane)
    x3 = x.reshape(n, c, hw)                          # free, contiguous reshape
    if c_pad != c:
        # Zero channels contribute 0 to the pooled sum and hit zero weight rows.
        x3 = jnp.pad(x3, ((0, 0), (0, c_pad - c), (0, 0)))

    # Fold the 1/(H*W) mean scale into the tiny transposed weight at trace time.
    w_t = weight.astype(jnp.float32).T * (1.0 / float(hw))          # (C, classes)
    w_t = jnp.pad(w_t, ((0, c_pad - c), (0, ncp - num_classes)))    # (c_pad, NCP)
    b_p = jnp.pad(bias.astype(jnp.float32),
                  (0, ncp - num_classes)).reshape(1, ncp)           # (1, NCP)

    # --- generation-aware VMEM budgeting ---------------------------------------
    vmem_cap = _vmem_capacity_bytes()
    total_budget = int(vmem_cap * 0.70)     # ~45 MiB on v7x, ~90 MiB on v5e/v6e
    vmem_limit = int(vmem_cap * 0.85)
    # Per-buffer cap on the x tile keeps each grid step's DMA a few microseconds.
    per_x_buf_cap = (16 * 1024 * 1024 if vmem_cap <= 64 * 1024 * 1024
                     else 32 * 1024 * 1024)

    # --- N tile -----------------------------------------------------------------
    if n % 8 != 0 or n < 16:
        n_tile = n                                   # full-N block (allowed)
    else:
        # Prefer >= 2 N-tiles so both v7x TensorCores get work on the "parallel"
        # axis; cap at 256 so one chunk fills the MXU systolic depth.
        n_cap = min(256, max(8, n // 2))
        n_tile = _largest_divisor_multiple(n, n_cap, 8)

    # --- C tile: account for 2x x-buffers, resident W^T, bias, acc, 2x out ------
    def _fixed_bytes(nt):
        return (2 * c_pad * ncp * 4                  # resident W^T (2 bufs, conservative)
                + 2 * ncp * 4                        # bias
                + nt * ncp * 4                       # f32 accumulator scratch
                + 2 * nt * ncp * out_itemsize)       # output (double-buffered)

    while True:
        remaining = total_budget - _fixed_bytes(n_tile)
        min_x_bytes = 2 * n_tile * sublane * hw * itemsize
        if remaining >= min_x_bytes or n_tile <= 8 or n_tile == n:
            break
        smaller = _largest_divisor_multiple(n, max(8, n_tile // 2), 8)
        if smaller >= n_tile:
            break
        n_tile = smaller

    remaining = max(total_budget - _fixed_bytes(n_tile),
                    2 * n_tile * sublane * hw * itemsize)
    per_x_buf = min(per_x_buf_cap, remaining // 2)
    c_target = max(sublane, per_x_buf // max(1, n_tile * hw * itemsize))
    c_tile = _largest_divisor_multiple(c_pad, c_target, sublane)

    grid = (n // n_tile, c_pad // c_tile)

    # Advisory cost: purely bandwidth bound on the x stream.
    bytes_accessed = int(n * c_pad * hw * itemsize
                         + c_pad * ncp * 4 + ncp * 4
                         + n * ncp * out_itemsize)
    flops = int(2 * n * c_pad * (hw + ncp))
    cost = pl.CostEstimate(flops=flops, transcendentals=0,
                           bytes_accessed=bytes_accessed)

    out_padded = pl.pallas_call(
        subnet_kernel,
        out_shape=jax.ShapeDtypeStruct((n, ncp), out_dtype),
        grid_spec=pltpu.PrefetchScalarGridSpec(
            num_scalar_prefetch=0,
            grid=grid,
            in_specs=[
                pl.BlockSpec((n_tile, c_tile, hw), lambda i, k: (i, k, 0)),  # x stream
                pl.BlockSpec((c_pad, ncp), lambda i, k: (0, 0)),             # resident W^T
                pl.BlockSpec((1, ncp), lambda i, k: (0, 0)),                 # bias
            ],
            out_specs=pl.BlockSpec((n_tile, ncp), lambda i, k: (i, 0)),
            scratch_shapes=[pltpu.VMEM((n_tile, ncp), jnp.float32)],
        ),
        compiler_params=pltpu.CompilerParams(
            dimension_semantics=("parallel", "arbitrary"),
            vmem_limit_bytes=vmem_limit,
        ),
        cost_estimate=cost,
    )(x3, w_t, b_p)

    # Drop the lane padding on the classes axis.
    return out_padded[:, :num_classes]


def reference_forward(x, weight, bias):
    pooled = x.astype(jnp.float32).mean(axis=3).mean(axis=2)
    return pooled @ weight.astype(jnp.float32).T + bias.astype(jnp.float32)


if __name__ == "__main__":
    # Small, deterministic synthetic shapes consistent with the forward pass.
    N, C, H, W = 2, 32, 16, 16
    NUM_CLASSES = 8

    key = jax.random.PRNGKey(0)
    kx, kw, kb = jax.random.split(key, 3)

    x = jax.random.normal(kx, (N, C, H, W), dtype=jnp.float32)
    # nn.Linear(C, NUM_CLASSES): weight (NUM_CLASSES, C), bias (NUM_CLASSES,)
    weight = jax.random.normal(kw, (NUM_CLASSES, C), dtype=jnp.float32) * 0.05
    bias = jax.random.normal(kb, (NUM_CLASSES,), dtype=jnp.float32) * 0.05

    out = subnet_forward(x, weight, bias)
    out = jax.block_until_ready(out)

    ref = reference_forward(x, weight, bias)
    assert out.shape == (N, NUM_CLASSES), out.shape
    assert jnp.allclose(out, ref, atol=1e-4, rtol=1e-4), "mismatch vs reference"

    print("KERNEL_OK")
</pallas_src>

<mosaic_0001>
module attributes {stable_mosaic.version = 11 : i64} {
  func.func @subnet_kernel(%arg0: i32, %arg1: i32, %arg2: memref<2x32x256xf32, #tpu.memory_space<vmem>>, %arg3: memref<32x128xf32, #tpu.memory_space<vmem>>, %arg4: memref<1x128xf32, #tpu.memory_space<vmem>>, %arg5: memref<2x128xf32, #tpu.memory_space<vmem>>, %arg6: memref<2x128xf32, #tpu.memory_space<vmem>>) attributes {dimension_semantics = [#tpu.dimension_semantics<parallel>, #tpu.dimension_semantics<arbitrary>], iteration_bounds = array<i64: 1, 1>, scalar_prefetch = 0 : i64, scratch_operands = 1 : i64, tpu.core_type = #tpu.core_type<tc>, window_params = [{transform_indices = @transform_0, window_bounds = array<i64: 2, 32, 256>}, {pipeline_mode = #tpu.pipeline_mode<synchronous>, transform_indices = @transform_1, window_bounds = array<i64: 32, 128>}, {pipeline_mode = #tpu.pipeline_mode<synchronous>, transform_indices = @transform_2, window_bounds = array<i64: 1, 128>}, {transform_indices = @transform_3, window_bounds = array<i64: 2, 128>}]} {
    %c0_i32 = arith.constant 0 : i32
    %0 = arith.cmpi eq, %arg1, %c0_i32 : i32
    %1 = arith.extui %0 : i1 to i32
    %c0_i32_0 = arith.constant 0 : i32
    %2 = arith.cmpi ne, %1, %c0_i32_0 : i32
    scf.if %2 {
      %cst_11 = arith.constant 0.000000e+00 : f32
      %16 = vector.broadcast %cst_11 : f32 to vector<2x128xf32>
      %c0_12 = arith.constant 0 : index
      %c0_13 = arith.constant 0 : index
      %17 = vector.load %arg6[%c0_12, %c0_13] : memref<2x128xf32, #tpu.memory_space<vmem>>, vector<2x128xf32>
      tpu.vector_store %arg6[%c0_12, %c0_13], %16 {strides = array<i32>} : memref<2x128xf32, #tpu.memory_space<vmem>>, vector<2x128xf32>,
    } else {
    }
    %c0 = arith.constant 0 : index
    %c0_1 = arith.constant 0 : index
    %c0_2 = arith.constant 0 : index
    %3 = vector.load %arg2[%c0, %c0_1, %c0_2] : memref<2x32x256xf32, #tpu.memory_space<vmem>>, vector<2x32x256xf32>
    %cst = arith.constant dense<0.000000e+00> : vector<2x32xf32>
    %4 = vector.multi_reduction <add>, %3, %cst [2] : vector<2x32x256xf32> to vector<2x32xf32>
    %c32_i32 = arith.constant 32 : i32
    %5 = arith.muli %arg1, %c32_i32 : i32
    %6 = tpu.assume_multiple %5, 32 : i32
    %7 = arith.index_cast %6 : i32 to index
    %c0_3 = arith.constant 0 : index
    %8 = vector.load %arg3[%7, %c0_3] : memref<32x128xf32, #tpu.memory_space<vmem>>, vector<32x128xf32>
    %c0_4 = arith.constant 0 : index
    %c0_5 = arith.constant 0 : index
    %9 = vector.load %arg6[%c0_4, %c0_5] : memref<2x128xf32, #tpu.memory_space<vmem>>, vector<2x128xf32>
    %cst_6 = arith.constant dense<0.000000e+00> : vector<2x128xf32>
    %10 = tpu.matmul %4, %8, %cst_6 {dimension_numbers = #tpu.dot_dimension_numbers<[1], [0], [0], [1], [0, 0, 1, 1], [], []>} : vector<2x32xf32>, vector<32x128xf32>, vector<2x128xf32> -> vector<2x128xf32>
    %11 = arith.addf %9, %10 : vector<2x128xf32>
    %c0_7 = arith.constant 0 : index
    %c0_8 = arith.constant 0 : index
    %12 = vector.load %arg6[%c0_7, %c0_8] : memref<2x128xf32, #tpu.memory_space<vmem>>, vector<2x128xf32>
    tpu.vector_store %arg6[%c0_7, %c0_8], %11 {strides = array<i32>} : memref<2x128xf32, #tpu.memory_space<vmem>>, vector<2x128xf32>,
    %c0_i32_9 = arith.constant 0 : i32
    %13 = arith.cmpi eq, %arg1, %c0_i32_9 : i32
    %14 = arith.extui %13 : i1 to i32
    %c0_i32_10 = arith.constant 0 : i32
    %15 = arith.cmpi ne, %14, %c0_i32_10 : i32
    scf.if %15 {
      %c0_11 = arith.constant 0 : index
      %c0_12 = arith.constant 0 : index
      %16 = vector.load %arg6[%c0_11, %c0_12] : memref<2x128xf32, #tpu.memory_space<vmem>>, vector<2x128xf32>
      %c0_13 = arith.constant 0 : index
      %c0_14 = arith.constant 0 : index
      %17 = vector.load %arg4[%c0_13, %c0_14] : memref<1x128xf32, #tpu.memory_space<vmem>>, vector<1x128xf32>
      %18 = vector.broadcast %17 : vector<1x128xf32> to vector<2x128xf32>
      %19 = arith.addf %16, %18 : vector<2x128xf32>
      %c0_15 = arith.constant 0 : index
      %c0_16 = arith.constant 0 : index
      %20 = vector.load %arg5[%c0_15, %c0_16] : memref<2x128xf32, #tpu.memory_space<vmem>>, vector<2x128xf32>
      tpu.vector_store %arg5[%c0_15, %c0_16], %19 {strides = array<i32>} : memref<2x128xf32, #tpu.memory_space<vmem>>, vector<2x128xf32>,
    } else {
    }
    return
  }
  func.func @transform_0(%arg0: i32, %arg1: i32) -> (i32, i32, i32) {
    %c0_i32 = arith.constant 0 : i32
    %c0_i32_0 = arith.constant 0 : i32
    return %arg0, %arg1, %c0_i32 : i32, i32, i32
  }
  func.func @transform_1(%arg0: i32, %arg1: i32) -> (i32, i32) {
    %c0_i32 = arith.constant 0 : i32
    %c0_i32_0 = arith.constant 0 : i32
    %c0_i32_1 = arith.constant 0 : i32
    return %c0_i32, %c0_i32_0 : i32, i32
  }
  func.func @transform_2(%arg0: i32, %arg1: i32) -> (i32, i32) {
    %c0_i32 = arith.constant 0 : i32
    %c0_i32_0 = arith.constant 0 : i32
    %c0_i32_1 = arith.constant 0 : i32
    return %c0_i32, %c0_i32_0 : i32, i32
  }
  func.func @transform_3(%arg0: i32, %arg1: i32) -> (i32, i32) {
    %c0_i32 = arith.constant 0 : i32
    %c0_i32_0 = arith.constant 0 : i32
    return %arg0, %c0_i32 : i32, i32
  }
}

</mosaic_0001>

<bundles_post_ra>
// kernel: tpu_custom_call.1
= control target key start
LH: loop header
LB: loop body
LE: loop exit
PB: predicated region body
PF: predicated region fallthrough
CT: control target
= control target key end

     0   :  { %8 = vsyncpa [#allocation4], 0  ;;  %s389_s0 = inlined_call_operand.hbm [shape: f32[2,32,256], index: 0, kind: input, shape index: {}]   ;;  %s390_s1 = inlined_call_operand.hbm [shape: f32[32,128], index: 1, kind: input, shape index: {}]   ;;  %s391_s2 = inlined_call_operand.vmem [shape: f32[1,128], index: 2, kind: input, shape index: {}]   ;;  %s392_s3 = inlined_call_operand.hbm [shape: f32[2,128], index: 3, kind: output, shape index: {}]  }
   0x1   :  { %9 = vsyncpa [#allocation7], 0 }
   0x2   :  { %10 = vsyncpa [#allocation5], 0  ;;  %s348_s12 = smov [#allocation3]  }
   0x3   :  { %s16_s13 = sshll.u32 %s348_s12, 4  ;;  %s17_s13 = int_to_ptr.vmem [resolvable:$true] %s16_s13 }
   0x4   :  { %s290_s14 = scalar_lea.vmem %s17_s13, 2048  ;;  %p295_p1 = scmp.lt.s32.totalorder %s17_s13, %s17_s13 }
   0x5   :  { %p291_p0 = scmp.ne.s32.totalorder %s17_s13, %s290_s14  ;;  %p296_p2 = scmp.lt.s32.totalorder %s290_s14, %s290_s14 }
   0x7   :  { %p297_p3 = por %p296_p2, %p295_p1 }
   0x9   :  { %p298_p4 = pnand %p297_p3, %p291_p0 }
   0xb   :  { %301 = shalt.err (!%p298_p4)
}
   0xc   :  { %s349_s15 = smov 256   ;;  %s350_s16 = smov 16  }
   0xd   :  { %22 = dma.hbm_to_vmem [thread:$0]  %s389_s0, 2048, %s17_s13, [#allocation4], %s349_s15, %s349_s15, %s350_s16  }
   0xe   :  { %s351_s19 = smov [#allocation6]  }
   0xf   :  { %s28_s20 = sshll.u32 %s351_s19, 4  ;;  %s29_s20 = int_to_ptr.vmem [resolvable:$true] %s28_s20 }
  0x10   :  { %s310_s21 = scalar_lea.vmem %s29_s20, 512  ;;  %p315_p6 = scmp.lt.s32.totalorder %s29_s20, %s29_s20 }
  0x11   :  { %p311_p5 = scmp.ne.s32.totalorder %s29_s20, %s310_s21  ;;  %p316_p7 = scmp.lt.s32.totalorder %s310_s21, %s310_s21 }
  0x13   :  { %p317_p8 = por %p316_p7, %p315_p6 }
  0x15   :  { %p318_p9 = pnand %p317_p8, %p311_p5 }
  0x17   :  { %321 = shalt.err (!%p318_p9)
}
  0x18   :  { %s352_s22 = smov 128   ;;  %s353_s23 = smov 8  }
  0x19   :  { %34 = dma.hbm_to_vmem [thread:$0]  %s390_s1, 512, %s29_s20, [#allocation7], %s352_s22, %s352_s22, %s353_s23  }
  0x1a   :  { %342 = dma.done.wait [#allocation4], 2048  }
  0x1b   :  { %343 = vsyncadd [#allocation4], 4294965248 }
  0x1c   :  { %344 = dma.done.wait [#allocation7], 512  }
  0x1d   :  { %345 = vsyncadd [#allocation7], 4294966784  ;;  %v56_v0 = vld [vmem:[#allocation3 + $0x40] sm:$0xff]  ;;  %v57_v1 = vld [vmem:[#allocation3 + $0x48] sm:$0xff]  ;;  %v354_v24 = vmov 0.0   ;;  %vm355_vm0 = vmmov 0   ;;  %v103_v29 = vlaneseq }
  0x1e   :  { %v48_v2 = vld [vmem:[#allocation3] sm:$0xff]  ;;  %v76_v3 = vadd.f32 %v57_v1, %v56_v0  ;;  %v49_v4 = vld [vmem:[#allocation3 + $0x8] sm:$0xff]  ;;  %v58_v5 = vld [vmem:[#allocation3 + $0x50] sm:$0xff]  ;;  %262 = vmatprep.subr.mxu0 %v354_v24  ;;  %47 = vst [vmem:[#allocation2] sm:$0x3] %v354_v24  ;;  %270 = vmatprep.mubr.msk.f32.mxu0 %vm355_vm0, %v354_v24  ;;  %vm114_vm1 = vcmask 130112  }
  0x1f   :  { %v59_v6 = vld [vmem:[#allocation3 + $0x58] sm:$0xff]  ;;  %v64_v7 = vadd.f32 %v49_v4, %v48_v2  ;;  %v50_v8 = vld [vmem:[#allocation3 + $0x10] sm:$0xff]  ;;  %v60_v12 = vld [vmem:[#allocation3 + $0x60] sm:$0xff]  ;;  %v104_v30 = vand.u32 127, %v103_v29  ;;  %v106_v35 = vshrl.u32 %v103_v29, 7  ;;  %vm121_vm2 = vcmask 195712  }
  0x20   :  { %v51_v9 = vld [vmem:[#allocation3 + $0x18] sm:$0xff]  ;;  %77 = vadd.xlane.f32.xlu1 %v76_v3  ;;  %v79_v10 = vadd.f32 %v59_v6, %v58_v5  ;;  %v61_v13 = vld [vmem:[#allocation3 + $0x68] sm:$0xff]  ;;  %v52_v14 = vld [vmem:[#allocation3 + $0x20] sm:$0xff]  ;;  %vm128_vm3 = vcmask 261312   ;;  %vm149_vm4 = vcmask 1041409   ;;  %vm151_vm5 = vcmask 261120  }
  0x21   :  { %65 = vadd.xlane.f32.xlu0 %v64_v7  ;;  %v67_v11 = vadd.f32 %v51_v9, %v50_v8  ;;  %v53_v15 = vld [vmem:[#allocation3 + $0x28] sm:$0xff]  ;;  %v82_v16 = vadd.f32 %v61_v13, %v60_v12  ;;  %v62_v18 = vld [vmem:[#allocation3 + $0x70] sm:$0xff]  ;;  %v63_v19 = vld [vmem:[#allocation3 + $0x78] sm:$0xff]  ;;  %v109_v33 = vadd.s32 4294967288, %v104_v30  ;;  %v116_v34 = vadd.s32 4294967280, %v104_v30  ;;  %s356_s26 = smov [#allocation8]  }
  0x22   :  { %v70_v17 = vadd.f32 %v53_v15, %v52_v14  ;;  %v54_v20 = vld [vmem:[#allocation3 + $0x30] sm:$0xff]  ;;  %v55_v21 = vld [vmem:[#allocation3 + $0x38] sm:$0xff]  ;;  %v85_v22 = vadd.f32 %v63_v19, %v62_v18  ;;  %v91_v27 = vld [vmem:[#allocation6 + $0x8] sm:$0xff]  ;;  %v123_v39 = vadd.s32 4294967272, %v104_v30  ;;  %v107_v41 = vsub.s32 %v104_v30, %v106_v35  ;;  %s245_s27 = sshll.u32 %s356_s26, 4  ;;  %s246_s27 = int_to_ptr.vmem [resolvable:$true] %s245_s27 }
  0x23   :  { %v73_v23 = vadd.f32 %v55_v21, %v54_v20  ;;  %v93_v25 = vld [vmem:[#allocation6 + $0x18] sm:$0xff]  ;;  %v92_v26 = vld [vmem:[#allocation6 + $0x10] sm:$0xff]  ;;  %v90_v28 = vld [vmem:[#allocation6] sm:$0xff]  ;;  %v112_v37 = vsub.s32 %v109_v33, %v106_v35  ;;  %v119_v40 = vsub.s32 %v116_v34, %v106_v35  ;;  %s322_s28 = scalar_lea.vmem %s246_s27, 32  ;;  %p327_p11 = scmp.lt.s32.totalorder %s246_s27, %s246_s27 }
  0x24   :  { %80 = vadd.xlane.f32.xlu1 %v79_v10  ;;  %263 = vmatpush3.msra.mxu0 %v93_v25  ;;  %v126_v45 = vsub.s32 %v123_v39, %v106_v35  ;;  %v256_v2 = vld [vmem:[%s391_s2] ss:$0 sm:$0xff]  ;;  %p323_p10 = scmp.ne.s32.totalorder %s246_s27, %s322_s28  ;;  %p328_p12 = scmp.lt.s32.totalorder %s322_s28, %s322_s28 }
  0x25   :  { %68 = vadd.xlane.f32.xlu0 %v67_v11  ;;  %264 = vmatprep.subr.mxu0 %v354_v24  ;;  %v94_v62 = vld [vmem:[#allocation2] sm:$0x3] }
  0x26   :  { %265 = vmatpush3.msra.mxu0 %v92_v26  ;;  %p329_p13 = por %p328_p12, %p327_p11 }
  0x27   :  { %266 = vmatprep.subr.mxu0 %v354_v24 }
  0x28   :  { %83 = vadd.xlane.f32.xlu1 %v82_v16  ;;  %267 = vmatpush3.msra.mxu0 %v91_v27  ;;  %p330_p0 = pnand %p329_p13, %p323_p10 }
  0x29   :  { %71 = vadd.xlane.f32.xlu0 %v70_v17  ;;  %268 = vmatprep.subr.mxu0 %v354_v24 }
  0x2a   :  { %269 = vmatpush3.msra.mxu0 %v90_v28 }
  0x2c   :  { %86 = vadd.xlane.f32.xlu1 %v85_v22 }
  0x2d   :  { %74 = vadd.xlane.f32.xlu0 %v73_v23 }
  0xa9   :  { %v78_v31 = vpop.xlane.xlu1 %77 }
  0xaa   :  { %v66_v32 = vpop.xlane.xlu0 %65  ;;  %v133_v48 = vrot.slane %v78_v31, %v107_v41 }
  0xab   :  { %v108_v50 = vrot.slane %v66_v32, %v107_v41 }
  0xad   :  { %v81_v36 = vpop.xlane.xlu1 %80 }
  0xae   :  { %v69_v38 = vpop.xlane.xlu0 %68  ;;  %v137_v43 = vrot.slane %v81_v36, %v112_v37 }
  0xaf   :  { %v113_v46 = vrot.slane %v69_v38, %v112_v37 }
  0xb0   :  { %v138_v52 = vsel %vm114_vm1, %v137_v43, %v133_v48 }
  0xb1   :  { %v84_v42 = vpop.xlane.xlu1 %83  ;;  %v115_v55 = vsel %vm114_vm1, %v113_v46, %v108_v50 }
  0xb2   :  { %v72_v44 = vpop.xlane.xlu0 %71  ;;  %v142_v47 = vrot.slane %v84_v42, %v119_v40 }
  0xb3   :  { %v120_v49 = vrot.slane %v72_v44, %v119_v40 }
  0xb4   :  { %v143_v56 = vsel %vm121_vm2, %v142_v47, %v138_v52 }
  0xb5   :  { %v87_v51 = vpop.xlane.xlu1 %86  ;;  %v122_v58 = vsel %vm121_vm2, %v120_v49, %v115_v55 }
  0xb6   :  { %v147_v53 = vrot.slane %v87_v51, %v126_v45  ;;  %v75_v54 = vpop.xlane.xlu0 %74 }
  0xb7   :  { %v127_v57 = vrot.slane %v75_v54, %v126_v45 }
  0xb8   :  { %v148_v59 = vsel %vm128_vm3, %v147_v53, %v143_v56 }
  0xb9   :  { %v129_v60 = vsel %vm128_vm3, %v127_v57, %v122_v58 }
  0xba   :  { %v150_v61 = vsel %vm149_vm4, %v148_v59, %v129_v60 }
  0xbb   :  { %271 = vmatmul.mubr.msk.f32.vlgmr.msra.gmra.mxu0 %vm151_vm5, %v150_v61 }
 0x17b   :  { %v220_v63 = vpop.f32.mrf.mxu0 }
 0x17c   :  { %v224_v0 = vadd.f32 %v220_v63, %v94_v62 }
 0x17d   :  { %v272_v1 = vpop.f32.mrf.mxu0 }
 0x17e   :  { %225 = vst [vmem:[#allocation2] sm:$0x3] %v224_v0 }
 0x185   :  { %v229_v3 = vld [vmem:[#allocation2] sm:$0x3] }
 0x186   :  { %v237_v4 = vadd.f32 %v256_v2, %v229_v3 }
 0x188   :  { %238 = vst [vmem:[#allocation8] sm:$0x3] %v237_v4 }
 0x189   :  { %333 = shalt.err (!%p330_p0)
}
 0x18a   :  { %248 = dma.vmem_to_hbm [thread:$0]  %s246_s27, 32, %s392_s3, [#allocation5]  }
 0x18b   :  { %346 = dma.done.wait [#allocation5], 32  }
 0x18c   :  { %347 = vsyncadd [#allocation5], 4294967264 }
 0x18d   :  { %252 = vsyncpa [#allocation4], 1 }
 0x18e   :  { %253 = vsyncpa [#allocation7], 1 }
 0x18f   :  { %254 = vsyncpa [#allocation5], 1 }

</bundles_post_ra>
